<compile_context>
chip_gen: v6e
topology: v6e:2x2x1
jax: 0.10.0
libtpu: 0.0.40
codegen_flags: <defaults>
</compile_context>

<pallas_src>
import functools

import jax
import jax.numpy as jnp
from jax.experimental import pallas as pl
from jax.experimental.pallas import tpu as pltpu


def se_kernel(x_ref, w1t_ref, w2t_ref, o_ref, *, channels_on_lanes):
    # x_ref block: (Bb, HW, C) if channels_on_lanes else (Bb, C, HW).
    x = x_ref[...]

    # --- squeeze: global sum over the spatial axis; 1/HW is folded into w1t.
    #     Accumulate in f32 regardless of the streaming dtype.
    reduce_axis = 1 if channels_on_lanes else 2
    pooled = jnp.sum(x.astype(jnp.float32), axis=reduce_axis)       # (Bb, C)

    # --- excitation: one batched GEMM pair per grid step (tiny; hidden under DMA).
    h = jnp.dot(pooled, w1t_ref[...],
                preferred_element_type=jnp.float32)                 # (Bb, hidden)
    h = jnp.maximum(h, 0.0)
    g = jnp.dot(h, w2t_ref[...],
                preferred_element_type=jnp.float32)                 # (Bb, C)
    s = jax.nn.sigmoid(g)                                           # (Bb, C)

    # --- scale: broadcast the per-(row, channel) gate over the spatial axis.
    gate = s.astype(x.dtype)
    gate = gate[:, None, :] if channels_on_lanes else gate[:, :, None]
    o_ref[...] = (x * gate).astype(o_ref.dtype)


def _device_tuning():
    """Per-generation (block byte budget, vmem_limit_bytes or None)."""
    try:
        kind = jax.devices()[0].device_kind.lower()
    except Exception:  # no accelerator visible at trace time
        kind = ""
    if "v7" in kind:
        # ~6 MiB blocks; 4 blocks (double-buffered in+out) = 24 MiB + weights,
        # raise the scoped limit to 28 MiB (physical per-TC is 64 MiB).
        return 6 << 20, 28 << 20, True
    if "v6" in kind:
        # 4 x 4 MiB = 16 MiB, comfortably under the 32 MiB default scoped limit.
        return 4 << 20, None, False
    # v5e (16 MiB default scoped limit) / unknown: stay conservative.
    return 2 << 20, None, False


def _pick_batch_block(B, row_bytes, target_bytes, prefer_even_steps):
    """Largest Bb under the byte budget, keeping >= 2 grid steps, and (on 2-TC
    chips) preferring an even step count so both TensorCores stay busy."""
    bb = int(max(1, min(B, target_bytes // max(row_bytes, 1))))
    if B >= 2:
        bb = min(bb, pl.cdiv(B, 2))          # at least 2 steps: overlap + megacore
    if prefer_even_steps and B >= 2:
        cand = bb
        while cand > 1 and pl.cdiv(B, cand) % 2 != 0:
            cand -= 1
        if pl.cdiv(B, cand) % 2 == 0:
            bb = cand
    return bb


def _channels_on_lanes(C, HW):
    """Put the lane-friendlier axis last (lane-dense stores)."""
    if HW % 128 == 0:
        return False
    if C % 128 == 0:
        return True
    return C > HW


def se_layer(x, w1, w2):
    """x:  (B, C, H, W) float (NCHW, matching PyTorch).
       w1: (hidden, C)  = nn.Linear(C, hidden, bias=False).weight
       w2: (C, hidden)  = nn.Linear(hidden, C, bias=False).weight
    """
    B, C, H, W = x.shape
    HW = H * W
    hidden = w1.shape[0]
    itemsize = jnp.dtype(x.dtype).itemsize

    c_on_lanes = _channels_on_lanes(C, HW)
    if c_on_lanes:
        xr = jnp.transpose(x.reshape(B, C, HW), (0, 2, 1))   # (B, HW, C), C on lanes
        blk_tail = (HW, C)
    else:
        xr = x.reshape(B, C, HW)                             # (B, C, HW), HW on lanes
        blk_tail = (C, HW)

    # Pre-fold the 1/HW mean scale into w1; pass weights pre-transposed so the
    # two in-kernel matmuls are plain row-major GEMMs.
    w1t = (w1 * (1.0 / HW)).T.astype(jnp.float32)            # (C, hidden)
    w2t = w2.T.astype(jnp.float32)                           # (hidden, C)

    target_bytes, vmem_limit, prefer_even = _device_tuning()
    row_bytes = C * HW * itemsize
    Bb = _pick_batch_block(B, row_bytes, target_bytes, prefer_even)
    grid = (pl.cdiv(B, Bb),)

    kernel = functools.partial(se_kernel, channels_on_lanes=c_on_lanes)

    cost = pl.CostEstimate(
        flops=2 * B * C * HW + 4 * B * C * hidden,           # pool + scale + 2 GEMMs
        bytes_accessed=2 * B * C * HW * itemsize + (2 * C * hidden) * 4,
        transcendentals=B * C,                               # sigmoid
    )

    out = pl.pallas_call(
        kernel,
        out_shape=jax.ShapeDtypeStruct(xr.shape, x.dtype),
        grid_spec=pltpu.PrefetchScalarGridSpec(
            num_scalar_prefetch=0,
            grid=grid,
            in_specs=[
                pl.BlockSpec((Bb,) + blk_tail, lambda b: (b, 0, 0)),
                pl.BlockSpec((C, hidden), lambda b: (0, 0)),   # revisited, not re-DMA'd
                pl.BlockSpec((hidden, C), lambda b: (0, 0)),
            ],
            out_specs=pl.BlockSpec((Bb,) + blk_tail, lambda b: (b, 0, 0)),
        ),
        compiler_params=pltpu.CompilerParams(
            dimension_semantics=("parallel",),   # lets v7x shard batch across 2 TCs
            vmem_limit_bytes=vmem_limit,
        ),
        cost_estimate=cost,
    )(xr, w1t, w2t)

    if c_on_lanes:
        out = jnp.transpose(out, (0, 2, 1))                  # back to (B, C, HW)
    return out.reshape(B, C, H, W)


def se_layer_ref(x, w1, w2):
    y = jnp.mean(x.astype(jnp.float32), axis=(2, 3))         # (B, C)
    y = jnp.maximum(y @ w1.T, 0.0)                           # (B, hidden)
    y = jax.nn.sigmoid(y @ w2.T)                             # (B, C)
    return (x.astype(jnp.float32) * y[:, :, None, None]).astype(x.dtype)


def _run_case(key, B, C, H, W, reduction):
    hidden = max(1, C // reduction)
    kx, k1, k2 = jax.random.split(key, 3)
    x = jax.random.normal(kx, (B, C, H, W), dtype=jnp.float32)
    w1 = jax.random.normal(k1, (hidden, C), dtype=jnp.float32) * (1.0 / jnp.sqrt(C))
    w2 = jax.random.normal(k2, (C, hidden), dtype=jnp.float32) * (1.0 / jnp.sqrt(hidden))

    out = se_layer(x, w1, w2)
    jax.block_until_ready(out)

    ref = se_layer_ref(x, w1, w2)
    assert out.shape == (B, C, H, W)
    assert jnp.allclose(out, ref, atol=1e-5, rtol=1e-5), (
        f"mismatch vs pure-JAX reference for shape {(B, C, H, W)}")


if __name__ == "__main__":
    key = jax.random.PRNGKey(0)
    k_a, k_b = jax.random.split(key)

    # Case 1: module defaults (channel=40, reduction=20); HW=256 -> spatial on lanes.
    _run_case(k_a, B=2, C=40, H=16, W=16, reduction=20)

    # Case 2: late-ResNet-style SE shape (HW=49, C=64) -> channels on lanes,
    # odd batch exercises the partial-last-block / grid-shaping path.
    _run_case(k_b, B=3, C=64, H=7, W=7, reduction=20)

    print("KERNEL_OK")
</pallas_src>

<mosaic_0001>
module attributes {stable_mosaic.version = 11 : i64} {
  func.func @se_kernel(%arg0: i32, %arg1: memref<1x40x256xf32, #tpu.memory_space<vmem>>, %arg2: memref<40x2xf32, #tpu.memory_space<vmem>>, %arg3: memref<2x40xf32, #tpu.memory_space<vmem>>, %arg4: memref<1x40x256xf32, #tpu.memory_space<vmem>>) attributes {dimension_semantics = [#tpu.dimension_semantics<parallel>], iteration_bounds = array<i64: 2>, scalar_prefetch = 0 : i64, scratch_operands = 0 : i64, tpu.core_type = #tpu.core_type<tc>, window_params = [{transform_indices = @transform_0, window_bounds = array<i64: 1, 40, 256>}, {pipeline_mode = #tpu.pipeline_mode<synchronous>, transform_indices = @transform_1, window_bounds = array<i64: 40, 2>}, {pipeline_mode = #tpu.pipeline_mode<synchronous>, transform_indices = @transform_2, window_bounds = array<i64: 2, 40>}, {transform_indices = @transform_3, window_bounds = array<i64: 1, 40, 256>}]} {
    %c0 = arith.constant 0 : index
    %c0_0 = arith.constant 0 : index
    %c0_1 = arith.constant 0 : index
    %0 = vector.load %arg1[%c0, %c0_0, %c0_1] : memref<1x40x256xf32, #tpu.memory_space<vmem>>, vector<1x40x256xf32>
    %cst = arith.constant dense<0.000000e+00> : vector<1x40xf32>
    %1 = vector.multi_reduction <add>, %0, %cst [2] : vector<1x40x256xf32> to vector<1x40xf32>
    %c0_2 = arith.constant 0 : index
    %c0_3 = arith.constant 0 : index
    %2 = vector.load %arg2[%c0_2, %c0_3] : memref<40x2xf32, #tpu.memory_space<vmem>>, vector<40x2xf32>
    %cst_4 = arith.constant dense<0.000000e+00> : vector<1x2xf32>
    %3 = tpu.matmul %1, %2, %cst_4 {dimension_numbers = #tpu.dot_dimension_numbers<[1], [0], [0], [1], [0, 0, 1, 1], [], []>} : vector<1x40xf32>, vector<40x2xf32>, vector<1x2xf32> -> vector<1x2xf32>
    %cst_5 = arith.constant 0.000000e+00 : f32
    %4 = vector.broadcast %cst_5 : f32 to vector<1x2xf32>
    %5 = arith.maximumf %3, %4 : vector<1x2xf32>
    %c0_6 = arith.constant 0 : index
    %c0_7 = arith.constant 0 : index
    %6 = vector.load %arg3[%c0_6, %c0_7] : memref<2x40xf32, #tpu.memory_space<vmem>>, vector<2x40xf32>
    %cst_8 = arith.constant dense<0.000000e+00> : vector<1x40xf32>
    %7 = tpu.matmul %5, %6, %cst_8 {dimension_numbers = #tpu.dot_dimension_numbers<[1], [0], [0], [1], [0, 0, 1, 1], [], []>} : vector<1x2xf32>, vector<2x40xf32>, vector<1x40xf32> -> vector<1x40xf32>
    %8 = arith.negf %7 : vector<1x40xf32>
    %9 = math.exp %8 : vector<1x40xf32>
    %cst_9 = arith.constant 1.000000e+00 : f32
    %10 = vector.broadcast %cst_9 : f32 to vector<1x40xf32>
    %11 = arith.addf %10, %9 : vector<1x40xf32>
    %12 = arith.divf %10, %11 : vector<1x40xf32>
    %13 = vector.shape_cast %12 : vector<1x40xf32> to vector<1x40x1xf32>
    %14 = vector.broadcast %13 : vector<1x40x1xf32> to vector<1x40x256xf32>
    %15 = arith.mulf %0, %14 : vector<1x40x256xf32>
    %c0_10 = arith.constant 0 : index
    %c0_11 = arith.constant 0 : index
    %c0_12 = arith.constant 0 : index
    %16 = vector.load %arg4[%c0_10, %c0_11, %c0_12] : memref<1x40x256xf32, #tpu.memory_space<vmem>>, vector<1x40x256xf32>
    tpu.vector_store %arg4[%c0_10, %c0_11, %c0_12], %15 {strides = array<i32>} : memref<1x40x256xf32, #tpu.memory_space<vmem>>, vector<1x40x256xf32>,
    return
  }
  func.func @transform_0(%arg0: i32) -> (i32, i32, i32) {
    %c0_i32 = arith.constant 0 : i32
    %c0_i32_0 = arith.constant 0 : i32
    %c0_i32_1 = arith.constant 0 : i32
    return %arg0, %c0_i32, %c0_i32_0 : i32, i32, i32
  }
  func.func @transform_1(%arg0: i32) -> (i32, i32) {
    %c0_i32 = arith.constant 0 : i32
    %c0_i32_0 = arith.constant 0 : i32
    %c0_i32_1 = arith.constant 0 : i32
    return %c0_i32, %c0_i32_0 : i32, i32
  }
  func.func @transform_2(%arg0: i32) -> (i32, i32) {
    %c0_i32 = arith.constant 0 : i32
    %c0_i32_0 = arith.constant 0 : i32
    %c0_i32_1 = arith.constant 0 : i32
    return %c0_i32, %c0_i32_0 : i32, i32
  }
  func.func @transform_3(%arg0: i32) -> (i32, i32, i32) {
    %c0_i32 = arith.constant 0 : i32
    %c0_i32_0 = arith.constant 0 : i32
    %c0_i32_1 = arith.constant 0 : i32
    return %arg0, %c0_i32, %c0_i32_0 : i32, i32, i32
  }
}

</mosaic_0001>

<bundles_post_ra>
// kernel: tpu_custom_call.1
= control target key start
LH: loop header
LB: loop body
LE: loop exit
PB: predicated region body
PF: predicated region fallthrough
CT: control target
= control target key end

     0   :  { %8 = vsyncpa [#allocation3], 0  ;;  %s977_s0 = inlined_call_operand.hbm [shape: f32[2,40,256], index: 0, kind: input, shape index: {}]   ;;  %s978_s1 = inlined_call_operand.vmem [shape: f32[40,2], index: 1, kind: input, shape index: {}]   ;;  %s979_s2 = inlined_call_operand.vmem [shape: f32[2,40], index: 2, kind: input, shape index: {}]   ;;  %s980_s3 = inlined_call_operand.hbm [shape: f32[2,40,256], index: 3, kind: output, shape index: {}]  }
   0x1   :  { %10 = vsyncpa [#allocation3 + $0x1], 0 }
   0x2   :  { %11 = vsyncpa [#allocation4], 0 }
   0x3   :  { %13 = vsyncpa [#allocation4 + $0x1], 0  ;;  %s767_s12 = smov 0   ;;  %s769_s13 = smov 0  }
   0x4   :  { %s771_s14 = smov 0   ;;  %s773_s15 = smov 0  }
   0x5 LB: > { %s788_s16 = sadd.s32 4294967295, %s737_s15   ;;  %s547_s17 = sadd.s32 4294967294, %s737_s15   ;;  %s737_s15 = sphi %s773_s15, %s994_s15   ;;  %s733_s14 = sphi %s771_s14, %s993_s14   ;;  %s729_s13 = sphi %s769_s13, %s992_s13   ;;  %s725_s12 = sphi %s767_s12, %s991_s12  }
   0x6   : > { %s792_s18 = sadd.s32 1, %s737_s15   ;;  %s26_s19 = sadd.s32 1, %s733_s14 }
   0x7   : > { %s23_s20 = ssub.s32 %s737_s15, %s792_s18  ;;  %p33_p0 = scmp.ne.s32.totalorder %s733_s14, %s729_s13 }
   0x8   : > { %p24_p1 = scmp.eq.s32.totalorder %s23_s20, 0  ;;  %p34_p2 = scmp.eq.s32.totalorder %s737_s15, 0 }
   0x9   : > { %p39_p3 = scmp.ne.s32.totalorder %s729_s13, %s725_s12  ;;  %p40_p4 = scmp.eq.s32.totalorder %s788_s16, 0 }
   0xa   : > { %s804_s21 = scalar_select %p24_p1, %s733_s14, %s26_s19  }
   0xb   : > { %p35_p5 = por %p34_p2, %p33_p0  ;;  %p806_p6 = por %p40_p4, %p39_p3 }
   0xc   : > { %p105_p7 = scmp.eq.s32.totalorder %s788_s16, 1  ;;  %p111_p8 = scmp.eq.s32.totalorder %s547_s17, 1 }
   0xd   : > { %s983_s22 = scalar_select %p806_p6, 1, 0 }
   0xe   : > { %p601_p10 = scmp.lt.s32.totalorder %s737_s15, 2  ;;  %p813_p11 = por %p105_p7, %p33_p0 }
   0xf   : > { %p817_p12 = por %p111_p8, %p39_p3  ;;  %s137_s25 = sand.u32 1, %s733_s14  }
  0x10   : > { %s984_s23 = scalar_select %p813_p11, 1, 0 }
  0x11   : > { %s985_s24 = scalar_select %p817_p12, 1, 0 }
  0x12   : > { %s586_s26 = smul.u32 1280, %s737_s15  ;;  %p828_p13 = pnand %p601_p10, %p35_p5 }
  0x13   : > { %s585_s27 = smul.u32 80, %s137_s25  ;;  %s834_s7 = scalar_lea.sflag [#allocation3], %s137_s25 }
  0x14   : > { %s826_s30 = scalar_lea.hbm %s977_s0, %s586_s26  ;;  %p647_p1 = pneg %p828_p13 }
  0x15   : > { %s141_s5 = scalar_lea.vmem [#allocation2], %s585_s27  ;;  %s645_s8 = scalar_lea.hbm %s826_s30, 1280 }
  0x16   : > { %s148_s6 = sshll.u32 %s141_s5, 4  ;;  %p646_p0 = scmp.ne.s32.totalorder %s826_s30, %s645_s8  ;;  %s832_s6 = int_to_ptr.vmem [resolvable:$true] %s148_s6 }
  0x17   : > { %s650_s11 = scalar_lea.hbm %s977_s0, 2560  ;;  %p651_p4 = scmp.lt.s32.totalorder %s826_s30, %s977_s0 }
  0x18   : > { %p648_p2 = pnand %p647_p1, %p646_p0  ;;  %p652_p5 = scmp.lt.s32.totalorder %s650_s11, %s645_s8 }
  0x1a   : > { %p649_p3 = pneg %p648_p2  ;;  %p653_p7 = por %p652_p5, %p651_p4 }
  0x1c   : > { %p654_p8 = pnand %p653_p7, %p649_p3 }
  0x1e   : > { %657 = shalt.err (!%p654_p8)
}
  0x1f   : > { %s658_s20 = scalar_lea.vmem %s832_s6, 1280  ;;  %s739_s25 = smov [#allocation2]  }
  0x20   : > { %p659_p10 = scmp.ne.s32.totalorder %s832_s6, %s658_s20  ;;  %s663_s26 = sshll.u32 %s739_s25, 4  ;;  %s664_s26 = int_to_ptr.vmem [resolvable:$false] %s663_s26 }
  0x21   : > { %s665_s27 = scalar_lea.vmem %s664_s26, 2560  ;;  %p666_p2 = scmp.lt.s32.totalorder %s832_s6, %s664_s26 }
  0x22   : > { %p661_p9 = pnand %p659_p10, %p647_p1  ;;  %p667_p12 = scmp.lt.s32.totalorder %s665_s27, %s658_s20 }
  0x24   : > { %p662_p0 = pneg %p661_p9  ;;  %p668_p11 = por %p667_p12, %p666_p2 }
  0x26   : > { %p669_p6 = pnand %p668_p11, %p662_p0 }
  0x28   : > { %672 = shalt.err (!%p669_p6)
}
  0x29   : > { %s740_s28 = smov 256   ;;  %s741_s29 = smov 16  }
  0x2a   : > { %596 = dma.hbm_to_vmem [thread:$0]  (!%p828_p13), %s826_s30, 1280, %s832_s6, %s834_s7, %s740_s28, %s740_s28, %s741_s29  }
  0x2b   : > { %p551_p9 = scmp.ge.s32.totalorder %s737_s15, 1  ;;  %p156_p1 = scmp.lt.s32.totalorder %s737_s15, 3 }
  0x2d   : > { %p157_p3 = pnand %p551_p9, %p156_p1 }
  0x2e   : > { %s858_s5 = sand.u32 (!%p157_p3), 1, %s729_s13   ;;  %p987_p6 = scmp.ne.s32.totalorder (!%p157_p3), %s983_s22, 0 }
  0x2f   : > { %160 = sbr.rel (%p157_p3) target bundleno = 770 (0x302), region = 32  ;;  %s163_s9 = scalar_lea.sflag (!%p157_p3), [#allocation3], %s858_s5 }
  0x30   : > { %s587_s8 = smul.u32 (!%p157_p3), 80, %s858_s5 }
  0x32   : > { %s166_s10 = scalar_lea.vmem (!%p157_p3), [#allocation2], %s587_s8 }
  0x34   : > { %716 = dma.done.wait (%p987_p6), %s163_s9, 1280  }
  0x35   : > { %718 = vsyncadd (%p987_p6), %s163_s9, 4294966016  ;;  %v868_v0 = vld [vmem:[%s166_s10] sm:$0xff]  ;;  %v870_v1 = vld [vmem:[%s166_s10 + $0x8] sm:$0xff]  ;;  %v742_v15 = vmov 0.0   ;;  %vm743_vm0 = vmmov 0   ;;  %v224_v21 = vlaneseq  ;;  %vm235_vm1 = vcmask 130112  }
  0x36   : > { %v872_v2 = vld [vmem:[%s166_s10 + $0x20] sm:$0xff]  ;;  %v199_v3 = vadd.f32 %v870_v1, %v868_v0  ;;  %v876_v4 = vld [vmem:[%s166_s10 + $0x28] sm:$0xff]  ;;  %v878_v5 = vld [vmem:[%s166_s10 + $0x10] sm:$0xff]  ;;  %567 = vmatprep.subr.mxu0 %v742_v15  ;;  %580 = vmatprep.subr.mxu1 %v742_v15  ;;  %vm242_vm2 = vcmask 195712   ;;  %vm249_vm3 = vcmask 261312   ;;  %vm256_vm4 = vcmask 326912  }
  0x37   : > { %v880_v6 = vld [vmem:[%s166_s10 + $0x18] sm:$0xff]  ;;  %v205_v7 = vadd.f32 %v876_v4, %v872_v2  ;;  %v884_v8 = vld [vmem:[%s166_s10 + $0x30] sm:$0xff]  ;;  %v892_v12 = vld [vmem:[%s166_s10 + $0x40] sm:$0xff]  ;;  %577 = vmatprep.mubr.msk.f32.mxu0 %vm743_vm0, %v742_v15  ;;  %582 = vmatprep.mubr.msk.f32.mxu1 %vm743_vm0, %v742_v15  ;;  %v225_v22 = vand.u32 127, %v224_v21  ;;  %v227_v23 = vshrl.u32 %v224_v21, 7  ;;  %vm258_vm5 = vcmask 326656  }
  0x38   : > { %v886_v9 = vld [vmem:[%s166_s10 + $0x38] sm:$0xff]  ;;  %200 = vadd.xlane.f32.xlu0 %v199_v3  ;;  %v202_v10 = vadd.f32 %v880_v6, %v878_v5  ;;  %v894_v13 = vld [vmem:[%s166_s10 + $0x48] sm:$0xff]  ;;  %v218_v16 = vld [vmem:[%s978_s1 + $0x20] sm:$0xff]  ;;  %vm337_vm6 = vcmask 1041408   ;;  %vm333_vm7 = vcmask 15360   ;;  %s188_s28 = scalar_lea.vmem [#allocation5], %s587_s8 }
  0x39   : > { %206 = vadd.xlane.f32.xlu1 %v205_v7  ;;  %v208_v11 = vadd.f32 %v886_v9, %v884_v8  ;;  %v211_v14 = vadd.f32 %v894_v13, %v892_v12  ;;  %568 = vmatpush3.msra.mxu0 %v218_v16  ;;  %v217_v17 = vld [vmem:[%s978_s1 + $0x18] sm:$0xff]  ;;  %v216_v18 = vld [vmem:[%s978_s1 + $0x10] sm:$0xff]  ;;  %v215_v19 = vld [vmem:[%s978_s1 + $0x8] sm:$0xff]  ;;  %v230_v24 = vadd.s32 4294967288, %v225_v22  ;;  %v237_v25 = vadd.s32 4294967280, %v225_v22  ;;  %s588_s29 = smul.u32 1280, %s788_s16 }
  0x3a   : > { %569 = vmatprep.subr.mxu0 %v742_v15  ;;  %v214_v20 = vld [vmem:[%s978_s1] sm:$0xff]  ;;  %v244_v26 = vadd.s32 4294967272, %v225_v22  ;;  %v228_v28 = vsub.s32 %v225_v22, %v227_v23  ;;  %v251_v31 = vadd.s32 4294967264, %v225_v22  ;;  %v419_v56 = vsub.s32 0, %v227_v23  ;;  %s474_s8 = sshll.u32 %s188_s28, 4  ;;  %s461_s16 = scalar_lea.sflag [#allocation4], %s858_s5  ;;  %s932_s8 = int_to_ptr.vmem [resolvable:$true] %s474_s8 }
  0x3b   : > { %570 = vmatpush3.msra.mxu0 %v217_v17  ;;  %v233_v30 = vsub.s32 %v230_v24, %v227_v23  ;;  %v240_v32 = vsub.s32 %v237_v25, %v227_v23  ;;  %v332_v47 = vld [vmem:[%s979_s2] sm:$0x3]  ;;  %s930_s22 = scalar_lea.hbm %s980_s3, %s588_s29  ;;  %s673_s30 = scalar_lea.vmem %s932_s8, 1280 }
  0x3c   : > { %203 = vadd.xlane.f32.xlu0 %v202_v10  ;;  %571 = vmatprep.subr.mxu0 %v742_v15  ;;  %v247_v33 = vsub.s32 %v244_v26, %v227_v23  ;;  %v254_v38 = vsub.s32 %v251_v31, %v227_v23  ;;  %p674_p11 = scmp.ne.s32.totalorder %s932_s8, %s673_s30  ;;  %p988_p12 = scmp.ne.s32.totalorder %s984_s23, 0 }
  0x3d   : > { %209 = vadd.xlane.f32.xlu1 %v208_v11  ;;  %572 = vmatpush3.msra.mxu0 %v216_v18  ;;  %s744_s4 = smov [#allocation5]  }
  0x3e   : > { %573 = vmatprep.subr.mxu0 %v742_v15  ;;  %581 = vmatpush3.msk.msra.mxu1 %vm337_vm6, %v332_v47  ;;  %p675_p13 = pnand %p674_p11, %p988_p12  ;;  %s677_s6 = sshll.u32 %s744_s4, 4  ;;  %s678_s6 = int_to_ptr.vmem [resolvable:$false] %s677_s6 }
  0x3f   : > { %574 = vmatpush3.msra.mxu0 %v215_v19  ;;  %s679_s7 = scalar_lea.vmem %s678_s6, 2560  ;;  %p680_p5 = scmp.lt.s32.totalorder %s932_s8, %s678_s6 }
  0x40   : > { %212 = vadd.xlane.f32.xlu0 %v211_v14  ;;  %575 = vmatprep.subr.mxu0 %v742_v15  ;;  %p676_p4 = pneg %p675_p13  ;;  %p681_p7 = scmp.lt.s32.totalorder %s679_s7, %s673_s30 }
  0x41   : > { %576 = vmatpush3.msra.mxu0 %v214_v20 }
  0x42   : > { %p682_p8 = por %p681_p7, %p680_p5 }
  0x44   : > { %p683_p10 = pnand %p682_p8, %p676_p4 }
  0xc1   : > { %v201_v27 = vpop.xlane.xlu0 %200 }
  0xc2   : > { %v207_v29 = vpop.xlane.xlu1 %206  ;;  %v229_v35 = vrot.slane %v201_v27, %v228_v28 }
  0xc3   : > { %v241_v39 = vrot.slane %v207_v29, %v240_v32 }
  0xc5   : > { %v204_v34 = vpop.xlane.xlu0 %203 }
  0xc6   : > { %v234_v36 = vrot.slane %v204_v34, %v233_v30  ;;  %v210_v37 = vpop.xlane.xlu1 %209 }
  0xc7   : > { %v248_v40 = vrot.slane %v210_v37, %v247_v33 }
  0xc8   : > { %v236_v41 = vsel %vm235_vm1, %v234_v36, %v229_v35 }
  0xc9   : > { %v243_v42 = vsel %vm242_vm2, %v241_v39, %v236_v41  ;;  %v213_v43 = vpop.xlane.xlu0 %212 }
  0xca   : > { %v250_v44 = vsel %vm249_vm3, %v248_v40, %v243_v42  ;;  %v255_v45 = vrot.slane %v213_v43, %v254_v38 }
  0xcc   : > { %v257_v46 = vsel %vm256_vm4, %v255_v45, %v250_v44 }
  0xcd   : > { %578 = vmatmul.mubr.msk.f32.vlgmr.msra.gmra.mxu0 %vm258_vm5, %v257_v46 }
 0x18d   : > { %v327_v48 = vpop.f32.mrf.mxu0 }
 0x18e   : > { %v331_v49 = vmax.f32 %v327_v48, 0.0 }
 0x18f   : > { %v579_v50 = vpop.f32.mrf.mxu0 }
 0x190   : > { %583 = vmatmul.mubr.msk.f32.vlgmr.msra.gmra.mxu1 %vm333_vm7, %v331_v49 }
 0x250   : > { %v407_v51 = vpop.f32.mrf.mxu1 }
 0x251   : > { %v555_v52 = vmul.f32 -1.442695, %v407_v51 }
 0x252   : > { %v584_v53 = vpop.f32.mrf.mxu1 }
 0x253   : > { %641 = vpow2.f32 %v555_v52 }
 0x260   : > { %v642_v54 = vpop.eup %641 }
 0x261   : > { %v414_v55 = vadd.f32 1.0, %v642_v54 }
 0x263   : > { %643 = vrcp.f32 %v414_v55 }
 0x270   : > { %v644_v57 = vpop.eup %643 }
 0x271   : > { %v420_v58 = vrot.slane %v644_v57, %v419_v56 }
 0x273   : > { %426 = vbcast.lane.b32.xlu0 %v420_v58, 264  ;;  %422 = vbcast.lane.b32.xlu1 %v420_v58, 256 }
 0x277   : > { %430 = vbcast.lane.b32.xlu1 %v420_v58, 272 }
 0x27b   : > { %434 = vbcast.lane.b32.xlu1 %v420_v58, 280 }
 0x27f   : > { %438 = vbcast.lane.b32.xlu1 %v420_v58, 288 }
 0x2e5   : > { %v427_v59 = vpop.permute.xlu0 %426  ;;  %v423_v60 = vpop.permute.xlu1 %422 }
 0x2e6   : > { %v442_v61 = vmul.f32 %v427_v59, %v878_v5  ;;  %v443_v62 = vmul.f32 %v427_v59, %v880_v6  ;;  %v440_v63 = vmul.f32 %v423_v60, %v868_v0  ;;  %v441_v3 = vmul.f32 %v423_v60, %v870_v1 }
 0x2e8   : > { %452 = vst [vmem:[%s188_s28 + $0x10] sm:$0xff] %v442_v61  ;;  %453 = vst [vmem:[%s188_s28 + $0x18] sm:$0xff] %v443_v62 }
 0x2e9   : > { %450 = vst [vmem:[%s188_s28] sm:$0xff] %v440_v63  ;;  %451 = vst [vmem:[%s188_s28 + $0x8] sm:$0xff] %v441_v3  ;;  %v431_v7 = vpop.permute.xlu1 %430 }
 0x2ea   : > { %v444_v10 = vmul.f32 %v431_v7, %v872_v2  ;;  %v445_v11 = vmul.f32 %v431_v7, %v876_v4 }
 0x2ec   : > { %454 = vst [vmem:[%s188_s28 + $0x20] sm:$0xff] %v444_v10  ;;  %455 = vst [vmem:[%s188_s28 + $0x28] sm:$0xff] %v445_v11 }
 0x2ed   : > { %v435_v5 = vpop.permute.xlu1 %434 }
 0x2ee   : > { %v446_v0 = vmul.f32 %v435_v5, %v884_v8  ;;  %v447_v1 = vmul.f32 %v435_v5, %v886_v9 }
 0x2f0   : > { %456 = vst [vmem:[%s188_s28 + $0x30] sm:$0xff] %v446_v0  ;;  %457 = vst [vmem:[%s188_s28 + $0x38] sm:$0xff] %v447_v1 }
 0x2f1   : > { %v439_v6 = vpop.permute.xlu1 %438 }
 0x2f2   : > { %v448_v2 = vmul.f32 %v439_v6, %v892_v12  ;;  %v449_v4 = vmul.f32 %v439_v6, %v894_v13 }
 0x2f4   : > { %458 = vst [vmem:[%s188_s28 + $0x40] sm:$0xff] %v448_v2  ;;  %459 = vst [vmem:[%s188_s28 + $0x48] sm:$0xff] %v449_v4 }
 0x2f5   : > { %686 = shalt.err (!%p683_p10)
}
 0x2f6   : > { %s687_s11 = scalar_lea.hbm %s930_s22, 1280  ;;  %s691_s20 = scalar_lea.hbm %s980_s3, 2560 }
 0x2f7   : > { %p688_p0 = scmp.ne.s32.totalorder %s930_s22, %s687_s11  ;;  %p692_p1 = scmp.lt.s32.totalorder %s930_s22, %s980_s3 }
 0x2f8   : > { %p693_p3 = scmp.lt.s32.totalorder %s691_s20, %s687_s11 }
 0x2f9   : > { %p689_p2 = pnand %p688_p0, %p988_p12 }
 0x2fa   : > { %p694_p6 = por %p693_p3, %p692_p1 }
 0x2fb   : > { %p690_p9 = pneg %p689_p2 }
 0x2fd   : > { %p695_p11 = pnand %p694_p6, %p690_p9 }
 0x2ff   : > { %698 = shalt.err (!%p695_p11)
}
 0x300   : > { %s745_s27 = smov 256   ;;  %s746_s28 = smov 16  }
 0x301   : > { %591 = dma.vmem_to_hbm [thread:$0]  (%p988_p12), %s932_s8, 1280, %s930_s22, %s461_s16, %s745_s27, %s745_s27, %s746_s28  }
 0x302 PF: > { %s489_s29 = sand.u32 1, %s725_s12   ;;  %p989_p13 = scmp.ne.s32.totalorder %s985_s24, 0 }
 0x303   : > { %p990_p4 = scmp.ge.s32.totalorder %s737_s15, 2  ;;  %s490_s9 = scalar_lea.sflag [#allocation4], %s489_s29 }
 0x305   : > { %p598_p5 = pnand %p990_p4, %p989_p13 }
 0x307   : > { %p599_p7 = pneg %p598_p5 }
 0x309   : > { %720 = dma.done.wait (%p599_p7), %s490_s9, 1280  }
 0x30a   : > { %722 = vsyncadd (%p599_p7), %s490_s9, 4294966016  ;;  %p16_p8 = scmp.ge.s32.totalorder %s792_s18, 4   ;;  %s991_s12 = smov %s729_s13 }
 0x30b   : > { %s992_s13 = smov %s733_s14  ;;  %s993_s14 = smov %s804_s21 }
 0x30c   : > { %s994_s15 = smov %s792_s18  ;;  %18 = sbr.rel (!%p16_p8) target bundleno = 5 (0x5), region = 77 }
 0x311   :  { %495 = vsyncpa [#allocation3], 1 }
 0x312   :  { %497 = vsyncpa [#allocation3 + $0x1], 1 }
 0x313   :  { %498 = vsyncpa [#allocation4], 1 }
 0x314   :  { %500 = vsyncpa [#allocation4 + $0x1], 1 }

</bundles_post_ra>
